<compile_context>
chip_gen: v5e
topology: v5e:2x2
jax: 0.10.0
libtpu: 0.0.40
codegen_flags: <defaults>
</compile_context>

<pallas_src>
import jax
import jax.numpy as jnp
import numpy as np
from jax.experimental import pallas as pl
from jax.experimental.pallas import tpu as pltpu

MLP_IN_DIM = 32
HID_DIMS = (64, 128, 64)
MLP_OUT_DIM = 1


def _round_up(x, m):
    return ((x + m - 1) // m) * m


def mlp3_kernel(x_ref,
                w1_ref, b1_ref,
                w2_ref, b2_ref,
                w3_ref, b3_ref,
                w4_ref, b4_ref,
                o_ref):
    f32 = jnp.float32
    cdt = x_ref.dtype  # dtype feeding the MXU (f32 or bf16)

    h = x_ref[...]
    # Linear(32 -> 64) + ReLU   (MXU, f32 accumulate; bias/ReLU in f32)
    h = jnp.dot(h, w1_ref[...], preferred_element_type=f32) + b1_ref[...]
    h = jnp.maximum(h, 0.0).astype(cdt)
    # Linear(64 -> 128) + ReLU
    h = jnp.dot(h, w2_ref[...], preferred_element_type=f32) + b2_ref[...]
    h = jnp.maximum(h, 0.0).astype(cdt)
    # Linear(128 -> 64) + ReLU
    h = jnp.dot(h, w3_ref[...], preferred_element_type=f32) + b3_ref[...]
    h = jnp.maximum(h, 0.0)  # stays f32 for the VPU final layer
    # Linear(64 -> 1): an N=1 MXU pass is >99% wasted and a [TILE_M, 1] output
    # forces masked stores, so compute it on the VPU (broadcast multiply + lane
    # reduction) and store the TILE_M results lane-dense as one (1,1,TILE_M) row.
    w4_row = w4_ref[...]                               # (1, 64) f32
    out = jnp.sum(h * w4_row, axis=-1) + b4_ref[0]     # (TILE_M,) f32
    o_ref[...] = out.reshape(o_ref.shape).astype(o_ref.dtype)


def mlp3_forward(x, params, *, tile_m=2048, compute_dtype=jnp.float32):
    """x: [B, 32]. params: list of (W [in, out], b [out]) for the 4 Linear layers."""
    (w1, b1), (w2, b2), (w3, b3), (w4, b4) = params
    batch = x.shape[0]

    # Batch tile: multiple of 8 (sublane), clamped to the (padded) batch size.
    tm = max(8, min(int(tile_m), _round_up(batch, 8)))
    tm = _round_up(tm, 8)
    b_pad = _round_up(batch, tm)
    num_tiles = b_pad // tm

    x_p = x.astype(compute_dtype)
    if b_pad != batch:
        x_p = jnp.pad(x_p, ((0, b_pad - batch), (0, 0)))

    # MXU operands in compute_dtype; everything elementwise stays f32.
    w1c = w1.astype(compute_dtype)
    w2c = w2.astype(compute_dtype)
    w3c = w3.astype(compute_dtype)
    b1r = b1.reshape(1, -1).astype(jnp.float32)
    b2r = b2.reshape(1, -1).astype(jnp.float32)
    b3r = b3.reshape(1, -1).astype(jnp.float32)
    w4_row = w4.reshape(1, -1).astype(jnp.float32)  # (1, 64), used on the VPU
    b4s = b4.reshape(1).astype(jnp.float32)         # scalar bias, lives in SMEM

    def const_spec(shape):
        # Full-shape block with a constant block index: DMA'd once, VMEM-resident.
        return pl.BlockSpec(shape, lambda i: (0, 0))

    in_specs = [
        pl.BlockSpec((tm, MLP_IN_DIM), lambda i: (i, 0)),   # x: streamed per tile
        const_spec(w1c.shape), const_spec(b1r.shape),
        const_spec(w2c.shape), const_spec(b2r.shape),
        const_spec(w3c.shape), const_spec(b3r.shape),
        const_spec(w4_row.shape),
        pl.BlockSpec(memory_space=pltpu.MemorySpace.SMEM),  # b4 scalar
    ]
    out_specs = pl.BlockSpec((1, 1, tm), lambda i: (i, 0, 0))
    out_shape = jax.ShapeDtypeStruct((num_tiles, 1, tm), jnp.float32)

    # Explicit VMEM budget: double-buffered x tile + double-buffered output slab
    # + f32 intermediates + params / compiler-scratch headroom.
    itm = jnp.dtype(compute_dtype).itemsize
    vmem_need = (2 * tm * MLP_IN_DIM * itm
                 + 2 * tm * 4
                 + 4 * tm * (HID_DIMS[1] + HID_DIMS[2]) * 4
                 + 4 * 1024 * 1024)
    vmem_limit = int(min(max(vmem_need, 8 * 1024 * 1024), 48 * 1024 * 1024))

    out_slab = pl.pallas_call(
        mlp3_kernel,
        grid=(num_tiles,),
        in_specs=in_specs,
        out_specs=out_specs,
        out_shape=out_shape,
        compiler_params=pltpu.CompilerParams(
            dimension_semantics=("parallel",),
            vmem_limit_bytes=vmem_limit),
    )(x_p, w1c, b1r, w2c, b2r, w3c, b3r, w4_row, b4s)

    return out_slab.reshape(b_pad)[:batch].reshape(batch, MLP_OUT_DIM)


def init_params(key):
    """W ~ N(0, 0.02) (mirrors weights_init); bias ~ torch Linear default U(-1/sqrt(in), 1/sqrt(in))."""
    dims = (MLP_IN_DIM,) + HID_DIMS + (MLP_OUT_DIM,)
    params = []
    for i in range(len(dims) - 1):
        key, wk, bk = jax.random.split(key, 3)
        w = 0.02 * jax.random.normal(wk, (dims[i], dims[i + 1]), dtype=jnp.float32)
        bound = 1.0 / float(np.sqrt(dims[i]))
        b = jax.random.uniform(bk, (dims[i + 1],), jnp.float32, -bound, bound)
        params.append((w, b))
    return params


def mlp3_reference(x, params):
    h = x.astype(jnp.float32)
    for i, (w, b) in enumerate(params):
        h = h @ w + b
        if i < len(params) - 1:
            h = jnp.maximum(h, 0.0)
    return h


if __name__ == "__main__":
    key = jax.random.PRNGKey(0)
    key, xk = jax.random.split(key)
    params = init_params(key)

    # Small primary check (batch=8 -> single tile).
    x = jax.random.normal(xk, (8, MLP_IN_DIM), dtype=jnp.float32)
    out = jax.block_until_ready(mlp3_forward(x, params))
    ref = mlp3_reference(x, params)
    assert out.shape == (8, MLP_OUT_DIM)
    np.testing.assert_allclose(np.asarray(out), np.asarray(ref),
                               rtol=1e-5, atol=1e-5)

    # Multi-tile + ragged batch (exercises grid, padding and lane-dense slab).
    key, xk2 = jax.random.split(key)
    x2 = jax.random.normal(xk2, (200, MLP_IN_DIM), dtype=jnp.float32)
    out2 = jax.block_until_ready(mlp3_forward(x2, params, tile_m=64))
    ref2 = mlp3_reference(x2, params)
    np.testing.assert_allclose(np.asarray(out2), np.asarray(ref2),
                               rtol=1e-5, atol=1e-5)

    # bf16 MXU operands (v6e/v7x path); f32 accumulation -> relaxed tolerance.
    out3 = jax.block_until_ready(
        mlp3_forward(x2, params, tile_m=128, compute_dtype=jnp.bfloat16))
    np.testing.assert_allclose(np.asarray(out3), np.asarray(ref2),
                               rtol=5e-2, atol=5e-4)

    print("KERNEL_OK")
</pallas_src>

<mosaic_0001>
module attributes {stable_mosaic.version = 11 : i64} {
  func.func @mlp3_kernel(%arg0: i32, %arg1: memref<8x32xf32, #tpu.memory_space<vmem>>, %arg2: memref<32x64xf32, #tpu.memory_space<vmem>>, %arg3: memref<1x64xf32, #tpu.memory_space<vmem>>, %arg4: memref<64x128xf32, #tpu.memory_space<vmem>>, %arg5: memref<1x128xf32, #tpu.memory_space<vmem>>, %arg6: memref<128x64xf32, #tpu.memory_space<vmem>>, %arg7: memref<1x64xf32, #tpu.memory_space<vmem>>, %arg8: memref<1x64xf32, #tpu.memory_space<vmem>>, %arg9: memref<1xf32, #tpu.memory_space<smem>>, %arg10: memref<1x1x8xf32, #tpu.memory_space<vmem>>) attributes {dimension_semantics = [#tpu.dimension_semantics<parallel>], iteration_bounds = array<i64: 1>, scalar_prefetch = 0 : i64, scratch_operands = 0 : i64, tpu.core_type = #tpu.core_type<tc>, window_params = [{transform_indices = @transform_0, window_bounds = array<i64: 8, 32>}, {pipeline_mode = #tpu.pipeline_mode<synchronous>, transform_indices = @transform_1, window_bounds = array<i64: 32, 64>}, {pipeline_mode = #tpu.pipeline_mode<synchronous>, transform_indices = @transform_2, window_bounds = array<i64: 1, 64>}, {pipeline_mode = #tpu.pipeline_mode<synchronous>, transform_indices = @transform_3, window_bounds = array<i64: 64, 128>}, {pipeline_mode = #tpu.pipeline_mode<synchronous>, transform_indices = @transform_4, window_bounds = array<i64: 1, 128>}, {pipeline_mode = #tpu.pipeline_mode<synchronous>, transform_indices = @transform_5, window_bounds = array<i64: 128, 64>}, {pipeline_mode = #tpu.pipeline_mode<synchronous>, transform_indices = @transform_6, window_bounds = array<i64: 1, 64>}, {pipeline_mode = #tpu.pipeline_mode<synchronous>, transform_indices = @transform_7, window_bounds = array<i64: 1, 64>}, {transform_indices = @transform_8, window_bounds = array<i64: 1>}, {transform_indices = @transform_9, window_bounds = array<i64: 1, 1, 8>}]} {
    %c0 = arith.constant 0 : index
    %c0_0 = arith.constant 0 : index
    %0 = vector.load %arg1[%c0, %c0_0] : memref<8x32xf32, #tpu.memory_space<vmem>>, vector<8x32xf32>
    %c0_1 = arith.constant 0 : index
    %c0_2 = arith.constant 0 : index
    %1 = vector.load %arg2[%c0_1, %c0_2] : memref<32x64xf32, #tpu.memory_space<vmem>>, vector<32x64xf32>
    %cst = arith.constant dense<0.000000e+00> : vector<8x64xf32>
    %2 = tpu.matmul %0, %1, %cst {dimension_numbers = #tpu.dot_dimension_numbers<[1], [0], [0], [1], [0, 0, 1, 1], [], []>} : vector<8x32xf32>, vector<32x64xf32>, vector<8x64xf32> -> vector<8x64xf32>
    %c0_3 = arith.constant 0 : index
    %c0_4 = arith.constant 0 : index
    %3 = vector.load %arg3[%c0_3, %c0_4] : memref<1x64xf32, #tpu.memory_space<vmem>>, vector<1x64xf32>
    %4 = vector.broadcast %3 : vector<1x64xf32> to vector<8x64xf32>
    %5 = arith.addf %2, %4 : vector<8x64xf32>
    %cst_5 = arith.constant 0.000000e+00 : f32
    %6 = vector.broadcast %cst_5 : f32 to vector<8x64xf32>
    %7 = arith.maximumf %5, %6 : vector<8x64xf32>
    %c0_6 = arith.constant 0 : index
    %c0_7 = arith.constant 0 : index
    %8 = vector.load %arg4[%c0_6, %c0_7] : memref<64x128xf32, #tpu.memory_space<vmem>>, vector<64x128xf32>
    %cst_8 = arith.constant dense<0.000000e+00> : vector<8x128xf32>
    %9 = tpu.matmul %7, %8, %cst_8 {dimension_numbers = #tpu.dot_dimension_numbers<[1], [0], [0], [1], [0, 0, 1, 1], [], []>} : vector<8x64xf32>, vector<64x128xf32>, vector<8x128xf32> -> vector<8x128xf32>
    %c0_9 = arith.constant 0 : index
    %c0_10 = arith.constant 0 : index
    %10 = vector.load %arg5[%c0_9, %c0_10] : memref<1x128xf32, #tpu.memory_space<vmem>>, vector<1x128xf32>
    %11 = vector.broadcast %10 : vector<1x128xf32> to vector<8x128xf32>
    %12 = arith.addf %9, %11 : vector<8x128xf32>
    %cst_11 = arith.constant 0.000000e+00 : f32
    %13 = vector.broadcast %cst_11 : f32 to vector<8x128xf32>
    %14 = arith.maximumf %12, %13 : vector<8x128xf32>
    %c0_12 = arith.constant 0 : index
    %c0_13 = arith.constant 0 : index
    %15 = vector.load %arg6[%c0_12, %c0_13] : memref<128x64xf32, #tpu.memory_space<vmem>>, vector<128x64xf32>
    %cst_14 = arith.constant dense<0.000000e+00> : vector<8x64xf32>
    %16 = tpu.matmul %14, %15, %cst_14 {dimension_numbers = #tpu.dot_dimension_numbers<[1], [0], [0], [1], [0, 0, 1, 1], [], []>} : vector<8x128xf32>, vector<128x64xf32>, vector<8x64xf32> -> vector<8x64xf32>
    %c0_15 = arith.constant 0 : index
    %c0_16 = arith.constant 0 : index
    %17 = vector.load %arg7[%c0_15, %c0_16] : memref<1x64xf32, #tpu.memory_space<vmem>>, vector<1x64xf32>
    %18 = vector.broadcast %17 : vector<1x64xf32> to vector<8x64xf32>
    %19 = arith.addf %16, %18 : vector<8x64xf32>
    %cst_17 = arith.constant 0.000000e+00 : f32
    %20 = vector.broadcast %cst_17 : f32 to vector<8x64xf32>
    %21 = arith.maximumf %19, %20 : vector<8x64xf32>
    %c0_18 = arith.constant 0 : index
    %c0_19 = arith.constant 0 : index
    %22 = vector.load %arg8[%c0_18, %c0_19] : memref<1x64xf32, #tpu.memory_space<vmem>>, vector<1x64xf32>
    %23 = vector.broadcast %22 : vector<1x64xf32> to vector<8x64xf32>
    %24 = arith.mulf %21, %23 : vector<8x64xf32>
    %cst_20 = arith.constant dense<0.000000e+00> : vector<8xf32>
    %25 = vector.multi_reduction <add>, %24, %cst_20 [1] : vector<8x64xf32> to vector<8xf32>
    %c0_21 = arith.constant 0 : index
    %26 = memref.load %arg9[%c0_21] : memref<1xf32, #tpu.memory_space<smem>>
    %27 = vector.broadcast %26 : f32 to vector<8xf32>
    %28 = arith.addf %25, %27 : vector<8xf32>
    %29 = vector.shape_cast %28 : vector<8xf32> to vector<1x1x8xf32>
    %c0_22 = arith.constant 0 : index
    %c0_23 = arith.constant 0 : index
    %c0_24 = arith.constant 0 : index
    %30 = vector.load %arg10[%c0_22, %c0_23, %c0_24] : memref<1x1x8xf32, #tpu.memory_space<vmem>>, vector<1x1x8xf32>
    tpu.vector_store %arg10[%c0_22, %c0_23, %c0_24], %29 {strides = array<i32>} : memref<1x1x8xf32, #tpu.memory_space<vmem>>, vector<1x1x8xf32>,
    return
  }
  func.func @transform_0(%arg0: i32) -> (i32, i32) {
    %c0_i32 = arith.constant 0 : i32
    %c0_i32_0 = arith.constant 0 : i32
    return %arg0, %c0_i32 : i32, i32
  }
  func.func @transform_1(%arg0: i32) -> (i32, i32) {
    %c0_i32 = arith.constant 0 : i32
    %c0_i32_0 = arith.constant 0 : i32
    %c0_i32_1 = arith.constant 0 : i32
    return %c0_i32, %c0_i32_0 : i32, i32
  }
  func.func @transform_2(%arg0: i32) -> (i32, i32) {
    %c0_i32 = arith.constant 0 : i32
    %c0_i32_0 = arith.constant 0 : i32
    %c0_i32_1 = arith.constant 0 : i32
    return %c0_i32, %c0_i32_0 : i32, i32
  }
  func.func @transform_3(%arg0: i32) -> (i32, i32) {
    %c0_i32 = arith.constant 0 : i32
    %c0_i32_0 = arith.constant 0 : i32
    %c0_i32_1 = arith.constant 0 : i32
    return %c0_i32, %c0_i32_0 : i32, i32
  }
  func.func @transform_4(%arg0: i32) -> (i32, i32) {
    %c0_i32 = arith.constant 0 : i32
    %c0_i32_0 = arith.constant 0 : i32
    %c0_i32_1 = arith.constant 0 : i32
    return %c0_i32, %c0_i32_0 : i32, i32
  }
  func.func @transform_5(%arg0: i32) -> (i32, i32) {
    %c0_i32 = arith.constant 0 : i32
    %c0_i32_0 = arith.constant 0 : i32
    %c0_i32_1 = arith.constant 0 : i32
    return %c0_i32, %c0_i32_0 : i32, i32
  }
  func.func @transform_6(%arg0: i32) -> (i32, i32) {
    %c0_i32 = arith.constant 0 : i32
    %c0_i32_0 = arith.constant 0 : i32
    %c0_i32_1 = arith.constant 0 : i32
    return %c0_i32, %c0_i32_0 : i32, i32
  }
  func.func @transform_7(%arg0: i32) -> (i32, i32) {
    %c0_i32 = arith.constant 0 : i32
    %c0_i32_0 = arith.constant 0 : i32
    %c0_i32_1 = arith.constant 0 : i32
    return %c0_i32, %c0_i32_0 : i32, i32
  }
  func.func @transform_8(%arg0: i32) -> i32 {
    %c0_i32 = arith.constant 0 : i32
    %c0_i32_0 = arith.constant 0 : i32
    return %c0_i32 : i32
  }
  func.func @transform_9(%arg0: i32) -> (i32, i32, i32) {
    %c0_i32 = arith.constant 0 : i32
    %c0_i32_0 = arith.constant 0 : i32
    %c0_i32_1 = arith.constant 0 : i32
    return %arg0, %c0_i32, %c0_i32_0 : i32, i32, i32
  }
}

</mosaic_0001>

<bundles_post_ra>
// kernel: tpu_custom_call.1
= control target key start
LH: loop header
LB: loop body
LE: loop exit
PB: predicated region body
PF: predicated region fallthrough
CT: control target
= control target key end

     0   :  { %vm43_vm0 = vcmask 261120   ;;  %s371_s0 = inlined_call_operand.vmem [shape: f32[8,32], index: 0, kind: input, shape index: {}]   ;;  %s372_s1 = inlined_call_operand.vmem [shape: f32[32,64], index: 1, kind: input, shape index: {}]   ;;  %s373_s2 = inlined_call_operand.vmem [shape: f32[1,64], index: 2, kind: input, shape index: {}]   ;;  %s374_s3 = inlined_call_operand.vmem [shape: f32[64,128], index: 3, kind: input, shape index: {}]   ;;  %s375_s4 = inlined_call_operand.vmem [shape: f32[1,128], index: 4, kind: input, shape index: {}]   ;;  %s376_s5 = inlined_call_operand.vmem [shape: f32[128,64], index: 5, kind: input, shape index: {}]   ;;  %s377_s6 = inlined_call_operand.vmem [shape: f32[1,64], index: 6, kind: input, shape index: {}]   ;;  %s378_s7 = inlined_call_operand.vmem [shape: f32[1,64], index: 7, kind: input, shape index: {}]   ;;  %s379_s8 = inlined_call_operand.<no memory space> [shape: f32[1], index: 8, kind: input, shape index: {}]   ;;  %s380_s9 = inlined_call_operand.hbm [shape: f32[1,1,8], index: 9, kind: output, shape index: {}]  }
   0x1   :  { %v38_v0 = vld [vmem:[%s372_s1 + $0x18] sm:$0xff]  ;;  %v37_v1 = vld [vmem:[%s372_s1 + $0x10] sm:$0xff]  ;;  %v36_v3 = vld [vmem:[%s372_s1 + $0x8] sm:$0xff] }
   0x2   :  { %59 = vmatpush.msra.mxu0 %v38_v0  ;;  %v75_v2 = vld [vmem:[%s374_s3 + $0x38] sm:$0xff]  ;;  %v74_v4 = vld [vmem:[%s374_s3 + $0x30] sm:$0xff]  ;;  %v35_v5 = vld [vmem:[%s372_s1] sm:$0xff] }
   0x3   :  { %92 = vmatpush.msra.mxu1 %v75_v2  ;;  %v73_v6 = vld [vmem:[%s374_s3 + $0x28] sm:$0xff]  ;;  %v34_v7 = vld [vmem:[%s371_s0] sm:$0xff] }
   0x4   :  { %60 = vmatpush.msra.mxu0 %v37_v1  ;;  %v72_v8 = vld [vmem:[%s374_s3 + $0x20] sm:$0xff] }
   0x5   :  { %93 = vmatpush.msra.mxu1 %v74_v4 }
   0x6   :  { %61 = vmatpush.msra.mxu0 %v36_v3 }
   0x7   :  { %15 = vsyncpa [#allocation4], 0  ;;  %94 = vmatpush.msra.mxu1 %v73_v6  ;;  %v71_v9 = vld [vmem:[%s374_s3 + $0x18] sm:$0xff]  ;;  %v70_v10 = vld [vmem:[%s374_s3 + $0x10] sm:$0xff]  ;;  %vm80_vm1 = vcmask 523264   ;;  %v158_v44 = vlaneseq  ;;  %v155_v45 = vstv %s379_s8  ;;  %s213_s26 = smov [#allocation3]  }
   0x8   :  { %62 = vmatpush.msra.mxu0 %v35_v5  ;;  %v69_v11 = vld [vmem:[%s374_s3 + $0x8] sm:$0xff]  ;;  %v68_v12 = vld [vmem:[%s374_s3] sm:$0xff]  ;;  %v120_v13 = vld [vmem:[%s376_s5 + $0x78] sm:$0xff]  ;;  %s171_s28 = sshll.u32 %s380_s9, 4  ;;  %vm162_vm2 = vcmask 57344   ;;  %s172_s28 = int_to_ptr.hbm [resolvable:$true] %s171_s28 }
   0x9   :  { %180 = vmatmul.msk.f32.vlgmr.msra.gmra.mxu0 %vm43_vm0, %v34_v7  ;;  %95 = vmatpush.msra.mxu1 %v72_v8  ;;  %v119_v14 = vld [vmem:[%s376_s5 + $0x70] sm:$0xff]  ;;  %v118_v15 = vld [vmem:[%s376_s5 + $0x68] sm:$0xff]  ;;  %v117_v16 = vld [vmem:[%s376_s5 + $0x60] sm:$0xff]  ;;  %v159_v46 = vand.u32 127, %v158_v44 }
   0xa   :  { %125 = vmatpush.msra.mxu2 %v120_v13  ;;  %v116_v17 = vld [vmem:[%s376_s5 + $0x58] sm:$0xff]  ;;  %v115_v18 = vld [vmem:[%s376_s5 + $0x50] sm:$0xff]  ;;  %v114_v19 = vld [vmem:[%s376_s5 + $0x48] sm:$0xff] }
   0xb   :  { %96 = vmatpush.msra.mxu1 %v71_v9  ;;  %v113_v20 = vld [vmem:[%s376_s5 + $0x40] sm:$0xff]  ;;  %v112_v21 = vld [vmem:[%s376_s5 + $0x38] sm:$0xff]  ;;  %v111_v22 = vld [vmem:[%s376_s5 + $0x30] sm:$0xff] }
   0xc   :  { %126 = vmatpush.msra.mxu2 %v119_v14  ;;  %v110_v23 = vld [vmem:[%s376_s5 + $0x28] sm:$0xff]  ;;  %v109_v24 = vld [vmem:[%s376_s5 + $0x20] sm:$0xff]  ;;  %v108_v25 = vld [vmem:[%s376_s5 + $0x18] sm:$0xff] }
   0xd   :  { %97 = vmatpush.msra.mxu1 %v70_v10  ;;  %v183_v26 = vld [vmem:[%s373_s2] ss:$0 sm:$0xff]  ;;  %v107_v30 = vld [vmem:[%s376_s5 + $0x10] sm:$0xff]  ;;  %v106_v31 = vld [vmem:[%s376_s5 + $0x8] sm:$0xff] }
   0xe   :  { %127 = vmatpush.msra.mxu2 %v118_v15  ;;  %v105_v32 = vld [vmem:[%s376_s5] sm:$0xff] }
   0xf   :  { %98 = vmatpush.msra.mxu1 %v69_v11  ;;  %v184_v33 = vld [vmem:[%s375_s4] ss:$0 sm:$0xff] }
  0x10   :  { %128 = vmatpush.msra.mxu2 %v117_v16  ;;  %v185_v37 = vld [vmem:[%s377_s6] ss:$0 sm:$0xff]  ;;  %s169_s6 = sshll.u32 %s213_s26, 4  ;;  %s170_s6 = int_to_ptr.vmem [resolvable:$true] %s169_s6 }
  0x11   :  { %99 = vmatpush.msra.mxu1 %v68_v12  ;;  %v186_v40 = vld [vmem:[%s378_s7] ss:$0 sm:$0xff] }
  0x12   :  { %129 = vmatpush.msra.mxu2 %v116_v17 }
  0x14   :  { %130 = vmatpush.msra.mxu2 %v115_v18 }
  0x16   :  { %131 = vmatpush.msra.mxu2 %v114_v19 }
  0x18   :  { %132 = vmatpush.msra.mxu2 %v113_v20 }
  0x1a   :  { %133 = vmatpush.msra.mxu2 %v112_v21 }
  0x1c   :  { %134 = vmatpush.msra.mxu2 %v111_v22 }
  0x1e   :  { %135 = vmatpush.msra.mxu2 %v110_v23 }
  0x20   :  { %136 = vmatpush.msra.mxu2 %v109_v24 }
  0x22   :  { %137 = vmatpush.msra.mxu2 %v108_v25 }
  0x24   :  { %138 = vmatpush.msra.mxu2 %v107_v30 }
  0x26   :  { %139 = vmatpush.msra.mxu2 %v106_v31 }
  0x28   :  { %140 = vmatpush.msra.mxu2 %v105_v32 }
  0x86   :  { %v64_v27 = vpop.f32.mrf.mxu0 }
  0x87   :  { %v65_v28 = vadd.f32 %v183_v26, %v64_v27 }
  0x89   :  { %v67_v29 = vmax.f32 %v65_v28, 0.0 }
  0x8b   :  { %181 = vmatmul.msk.f32.vlgmr.msra.gmra.mxu1 %vm80_vm1, %v67_v29 }
 0x108   :  { %v101_v34 = vpop.f32.mrf.mxu1 }
 0x109   :  { %v102_v35 = vadd.f32 %v184_v33, %v101_v34 }
 0x10b   :  { %v104_v36 = vmax.f32 %v102_v35, 0.0 }
 0x10d   :  { %141 = vmatmul.f32.vlgmr.msra.gmra.mxu2 %v104_v36 }
 0x190   :  { %v142_v38 = vpop.f32.mrf.mxu2 }
 0x191   :  { %v143_v39 = vadd.f32 %v185_v37, %v142_v38 }
 0x193   :  { %v145_v41 = vmax.f32 %v143_v39, 0.0 }
 0x195   :  { %v150_v42 = vmul.f32 %v186_v40, %v145_v41 }
 0x197   :  { %v151_v43 = vsel %vm80_vm1, %v150_v42, 0.0 }
 0x198   :  { %152 = vadd.xlane.f32.xlu0 %v151_v43 }
 0x20b   :  { %v153_v47 = vpop.xlane.xlu0 %152 }
 0x20c   :  { %v156_v48 = vadd.f32 %v155_v45, %v153_v47 }
 0x20e   :  { %v160_v49 = vperm.slane %v156_v48, %v159_v46 }
 0x210   :  { %163 = vst.msk [vmem:[#allocation3] sm:$0x1] %vm162_vm2, %v160_v49 }
 0x211   :  { %174 = dma.vmem_to_hbm [thread:$0]  %s170_s6, 16, %s172_s28, [#allocation4]  }
 0x212   :  { %211 = dma.done.wait [#allocation4], 16  }
 0x213   :  { %212 = vsyncadd [#allocation4], 4294967280 }
 0x214   :  { %179 = vsyncpa [#allocation4], 1 }

</bundles_post_ra>
